<compile_context>
chip_gen: v5e
topology: v5e:2x2
jax: 0.10.0
libtpu: 0.0.40
codegen_flags: <defaults>
</compile_context>

<pallas_src>
import jax
import jax.numpy as jnp
from jax.experimental import pallas as pl
from jax.experimental.pallas import tpu as pltpu


def _round_up(n, m):
    return ((n + m - 1) // m) * m


def _net_baseline_kernel(x_ref, w1_ref, b1_ref, w2_ref, b2_ref, out_ref):
    # Hidden layer on the MXU: (TB, D) @ (D, H) + (1, H) -> ReLU
    h = jnp.dot(x_ref[...], w1_ref[...], preferred_element_type=jnp.float32)
    h = jnp.maximum(h + b1_ref[...], 0.0)
    # Output layer: N=1 matmul replaced by VPU mul + lane (XLU) reduce.
    # w2_ref is the (1, H) row vector of the (H, 1) weight.
    o = jnp.sum(h * w2_ref[...], axis=-1, keepdims=True)        # (TB, 1)
    o = jnp.tanh(o + b2_ref[0, 0])                               # b2 scalar from SMEM
    out_ref[...] = o.astype(out_ref.dtype)


def net_baseline_forward(x, w1, b1, w2, b2, *, tile_b=512):
    """x: (B, D) f32; w1: (D, H); b1: (1, H); w2: (H, 1); b2: (1, 1)."""
    B, D = x.shape
    H = w1.shape[1]

    w2_row = w2.reshape(1, H)      # (H, 1) -> (1, H) for the VPU mul
    b2_s = b2.reshape(1, 1)

    # Pick a sublane-aligned batch tile, pad B up to a multiple of it.
    tb = min(tile_b, _round_up(B, 8))
    b_pad = _round_up(B, tb)
    if b_pad != B:
        x = jnp.pad(x, ((0, b_pad - B), (0, 0)))
    grid = (pl.cdiv(b_pad, tb),)

    cost = pl.CostEstimate(
        flops=2 * b_pad * D * H + 4 * b_pad * H,
        transcendentals=b_pad,
        bytes_accessed=4 * (b_pad * D + D * H + 2 * H + 1 + b_pad),
    )

    out = pl.pallas_call(
        _net_baseline_kernel,
        out_shape=jax.ShapeDtypeStruct((b_pad, 1), jnp.float32),
        grid_spec=pltpu.PrefetchScalarGridSpec(
            num_scalar_prefetch=0,
            grid=grid,
            in_specs=[
                # Streamed over the batch tiles.
                pl.BlockSpec((tb, D), lambda i: (i, 0)),
                # Weights / biases: constant block index -> resident in VMEM.
                pl.BlockSpec((D, H), lambda i: (0, 0)),
                pl.BlockSpec((1, H), lambda i: (0, 0)),
                pl.BlockSpec((1, H), lambda i: (0, 0)),
                # b2: single scalar, keep it in SMEM.
                pl.BlockSpec(memory_space=pltpu.MemorySpace.SMEM),
            ],
            out_specs=pl.BlockSpec((tb, 1), lambda i: (i, 0)),
        ),
        compiler_params=pltpu.CompilerParams(
            dimension_semantics=("parallel",),
            vmem_limit_bytes=32 * 1024 * 1024,
        ),
        cost_estimate=cost,
    )(x, w1, b1, w2_row, b2_s)

    return out[:B]


def init_params(key, input_dim, hidden_dim):
    """Deterministic init mimicking PyTorch nn.Linear (uniform +/- 1/sqrt(fan_in))."""
    k1, k2, k3, k4 = jax.random.split(key, 4)
    bound1 = 1.0 / jnp.sqrt(input_dim)
    bound2 = 1.0 / jnp.sqrt(hidden_dim)
    # Stored pre-transposed: (in, out)
    w1 = jax.random.uniform(k1, (input_dim, hidden_dim), jnp.float32, -bound1, bound1)
    b1 = jax.random.uniform(k2, (1, hidden_dim), jnp.float32, -bound1, bound1)
    w2 = jax.random.uniform(k3, (hidden_dim, 1), jnp.float32, -bound2, bound2)
    b2 = jax.random.uniform(k4, (1, 1), jnp.float32, -bound2, bound2)
    return w1, b1, w2, b2


def _reference(x, w1, b1, w2, b2):
    return jnp.tanh(jnp.maximum(x @ w1 + b1, 0.0) @ w2 + b2)


if __name__ == "__main__":
    key = jax.random.PRNGKey(0)
    k_x, k_x2, k_p = jax.random.split(key, 3)

    batch, input_dim, hidden_dim = 8, 16, 32
    w1, b1, w2, b2 = init_params(k_p, input_dim, hidden_dim)

    # Small batch (single tile, no padding).
    x = jax.random.normal(k_x, (batch, input_dim), jnp.float32)
    out = jax.block_until_ready(net_baseline_forward(x, w1, b1, w2, b2))
    ref = _reference(x, w1, b1, w2, b2)
    assert out.shape == (batch, 1)
    assert jnp.allclose(out, ref, atol=1e-5, rtol=1e-5)

    # Larger batch: exercises the tiled grid + padding path (B=1000 -> 2 tiles of 512).
    big_batch = 1000
    x_big = jax.random.normal(k_x2, (big_batch, input_dim), jnp.float32)
    out_big = jax.block_until_ready(net_baseline_forward(x_big, w1, b1, w2, b2))
    ref_big = _reference(x_big, w1, b1, w2, b2)
    assert out_big.shape == (big_batch, 1)
    assert jnp.allclose(out_big, ref_big, atol=1e-5, rtol=1e-5)

    print("KERNEL_OK")
</pallas_src>

<mosaic_0001>
module attributes {stable_mosaic.version = 11 : i64} {
  func.func @_net_baseline_kernel(%arg0: i32, %arg1: memref<8x16xf32, #tpu.memory_space<vmem>>, %arg2: memref<16x32xf32, #tpu.memory_space<vmem>>, %arg3: memref<1x32xf32, #tpu.memory_space<vmem>>, %arg4: memref<1x32xf32, #tpu.memory_space<vmem>>, %arg5: memref<1x1xf32, #tpu.memory_space<smem>>, %arg6: memref<8x1xf32, #tpu.memory_space<vmem>>) attributes {dimension_semantics = [#tpu.dimension_semantics<parallel>], iteration_bounds = array<i64: 1>, scalar_prefetch = 0 : i64, scratch_operands = 0 : i64, tpu.core_type = #tpu.core_type<tc>, window_params = [{transform_indices = @transform_0, window_bounds = array<i64: 8, 16>}, {pipeline_mode = #tpu.pipeline_mode<synchronous>, transform_indices = @transform_1, window_bounds = array<i64: 16, 32>}, {pipeline_mode = #tpu.pipeline_mode<synchronous>, transform_indices = @transform_2, window_bounds = array<i64: 1, 32>}, {pipeline_mode = #tpu.pipeline_mode<synchronous>, transform_indices = @transform_3, window_bounds = array<i64: 1, 32>}, {transform_indices = @transform_4, window_bounds = array<i64: 1, 1>}, {transform_indices = @transform_5, window_bounds = array<i64: 8, 1>}]} {
    %c0 = arith.constant 0 : index
    %c0_0 = arith.constant 0 : index
    %0 = vector.load %arg1[%c0, %c0_0] : memref<8x16xf32, #tpu.memory_space<vmem>>, vector<8x16xf32>
    %c0_1 = arith.constant 0 : index
    %c0_2 = arith.constant 0 : index
    %1 = vector.load %arg2[%c0_1, %c0_2] : memref<16x32xf32, #tpu.memory_space<vmem>>, vector<16x32xf32>
    %cst = arith.constant dense<0.000000e+00> : vector<8x32xf32>
    %2 = tpu.matmul %0, %1, %cst {dimension_numbers = #tpu.dot_dimension_numbers<[1], [0], [0], [1], [0, 0, 1, 1], [], []>} : vector<8x16xf32>, vector<16x32xf32>, vector<8x32xf32> -> vector<8x32xf32>
    %c0_3 = arith.constant 0 : index
    %c0_4 = arith.constant 0 : index
    %3 = vector.load %arg3[%c0_3, %c0_4] : memref<1x32xf32, #tpu.memory_space<vmem>>, vector<1x32xf32>
    %4 = vector.broadcast %3 : vector<1x32xf32> to vector<8x32xf32>
    %5 = arith.addf %2, %4 : vector<8x32xf32>
    %cst_5 = arith.constant 0.000000e+00 : f32
    %6 = vector.broadcast %cst_5 : f32 to vector<8x32xf32>
    %7 = arith.maximumf %5, %6 : vector<8x32xf32>
    %c0_6 = arith.constant 0 : index
    %c0_7 = arith.constant 0 : index
    %8 = vector.load %arg4[%c0_6, %c0_7] : memref<1x32xf32, #tpu.memory_space<vmem>>, vector<1x32xf32>
    %9 = vector.broadcast %8 : vector<1x32xf32> to vector<8x32xf32>
    %10 = arith.mulf %7, %9 : vector<8x32xf32>
    %cst_8 = arith.constant dense<0.000000e+00> : vector<8xf32>
    %11 = vector.multi_reduction <add>, %10, %cst_8 [1] : vector<8x32xf32> to vector<8xf32>
    %12 = vector.shape_cast %11 : vector<8xf32> to vector<8x1xf32>
    %c0_9 = arith.constant 0 : index
    %c0_10 = arith.constant 0 : index
    %13 = memref.load %arg5[%c0_9, %c0_10] : memref<1x1xf32, #tpu.memory_space<smem>>
    %14 = vector.broadcast %13 : f32 to vector<8x1xf32>
    %15 = arith.addf %12, %14 : vector<8x1xf32>
    %16 = math.tanh %15 : vector<8x1xf32>
    %c0_11 = arith.constant 0 : index
    %c0_12 = arith.constant 0 : index
    %17 = vector.load %arg6[%c0_11, %c0_12] : memref<8x1xf32, #tpu.memory_space<vmem>>, vector<8x1xf32>
    tpu.vector_store %arg6[%c0_11, %c0_12], %16 {strides = array<i32>} : memref<8x1xf32, #tpu.memory_space<vmem>>, vector<8x1xf32>,
    return
  }
  func.func @transform_0(%arg0: i32) -> (i32, i32) {
    %c0_i32 = arith.constant 0 : i32
    %c0_i32_0 = arith.constant 0 : i32
    return %arg0, %c0_i32 : i32, i32
  }
  func.func @transform_1(%arg0: i32) -> (i32, i32) {
    %c0_i32 = arith.constant 0 : i32
    %c0_i32_0 = arith.constant 0 : i32
    %c0_i32_1 = arith.constant 0 : i32
    return %c0_i32, %c0_i32_0 : i32, i32
  }
  func.func @transform_2(%arg0: i32) -> (i32, i32) {
    %c0_i32 = arith.constant 0 : i32
    %c0_i32_0 = arith.constant 0 : i32
    %c0_i32_1 = arith.constant 0 : i32
    return %c0_i32, %c0_i32_0 : i32, i32
  }
  func.func @transform_3(%arg0: i32) -> (i32, i32) {
    %c0_i32 = arith.constant 0 : i32
    %c0_i32_0 = arith.constant 0 : i32
    %c0_i32_1 = arith.constant 0 : i32
    return %c0_i32, %c0_i32_0 : i32, i32
  }
  func.func @transform_4(%arg0: i32) -> (i32, i32) {
    %c0_i32 = arith.constant 0 : i32
    %c0_i32_0 = arith.constant 0 : i32
    %c0_i32_1 = arith.constant 0 : i32
    return %c0_i32, %c0_i32_0 : i32, i32
  }
  func.func @transform_5(%arg0: i32) -> (i32, i32) {
    %c0_i32 = arith.constant 0 : i32
    %c0_i32_0 = arith.constant 0 : i32
    return %arg0, %c0_i32 : i32, i32
  }
}

</mosaic_0001>

<bundles_post_ra>
// kernel: tpu_custom_call.1
= control target key start
LH: loop header
LB: loop body
LE: loop exit
PB: predicated region body
PF: predicated region fallthrough
CT: control target
= control target key end

     0   :  { %11 = vsyncpa [#allocation4], 0  ;;  %s217_s0 = inlined_call_operand.hbm [shape: f32[8,16], index: 0, kind: input, shape index: {}]   ;;  %s218_s1 = inlined_call_operand.hbm [shape: f32[16,32], index: 1, kind: input, shape index: {}]   ;;  %s219_s2 = inlined_call_operand.vmem [shape: f32[1,32], index: 2, kind: input, shape index: {}]   ;;  %s220_s3 = inlined_call_operand.vmem [shape: f32[1,32], index: 3, kind: input, shape index: {}]   ;;  %s221_s4 = inlined_call_operand.<no memory space> [shape: f32[1,1], index: 4, kind: input, shape index: {}]   ;;  %s222_s5 = inlined_call_operand.vmem [shape: f32[8,1], index: 5, kind: output, shape index: {}]  }
   0x1   :  { %s18_s20 = sshll.u32 %s217_s0, 4  ;;  %s19_s20 = int_to_ptr.hbm [resolvable:$true] %s18_s20 }
   0x2   :  { %12 = vsyncpa [#allocation6], 0  ;;  %s165_s21 = smov [#allocation3]   ;;  %s28_s25 = sshll.u32 %s218_s1, 4  ;;  %s29_s25 = int_to_ptr.hbm [resolvable:$true] %s28_s25 }
   0x3   :  { %s20_s22 = sshll.u32 %s165_s21, 4  ;;  %s166_s26 = smov [#allocation5]   ;;  %s21_s22 = int_to_ptr.vmem [resolvable:$true] %s20_s22 }
   0x4   :  { %23 = dma.hbm_to_vmem [thread:$0]  %s19_s20, 128, %s21_s22, [#allocation4]  }
   0x5   :  { %s30_s27 = sshll.u32 %s166_s26, 4  ;;  %s167_s28 = smov 128   ;;  %s31_s27 = int_to_ptr.vmem [resolvable:$true] %s30_s27 }
   0x6   :  { %s168_s29 = smov 8  }
   0x7   :  { %36 = dma.hbm_to_vmem [thread:$0]  %s29_s25, 256, %s31_s27, [#allocation6], %s167_s28, %s167_s28, %s168_s29  }
   0x8   :  { %161 = dma.done.wait [#allocation4], 128  }
   0x9   :  { %162 = vsyncadd [#allocation4], 4294967168 }
   0xa   :  { %163 = dma.done.wait [#allocation6], 256  }
   0xb   :  { %164 = vsyncadd [#allocation6], 4294967040  ;;  %v53_v0 = vld [vmem:[#allocation5 + $0x8] sm:$0xff]  ;;  %v52_v1 = vld [vmem:[#allocation5] sm:$0xff]  ;;  %vm58_vm0 = vcmask 130048   ;;  %vm88_vm1 = vcmask 261120   ;;  %v93_v10 = vstv %s221_s4 }
   0xc   :  { %76 = vmatpush.msra.mxu0 %v53_v0  ;;  %v51_v2 = vld [vmem:[#allocation3] sm:$0xff]  ;;  %vm96_vm2 = vcmask 7168  }
   0xd   :  { %v109_v3 = vld [vmem:[%s219_s2] ss:$0 sm:$0xff] }
   0xe   :  { %77 = vmatpush.msra.mxu0 %v52_v1  ;;  %v110_v6 = vld [vmem:[%s220_s3] ss:$0 sm:$0xff] }
   0xf   :  { %104 = vmatmul.msk.f32.vlgmr.msra.gmra.mxu0 %vm58_vm0, %v51_v2 }
  0x8c   :  { %v79_v4 = vpop.f32.mrf.mxu0 }
  0x8d   :  { %v80_v5 = vadd.f32 %v109_v3, %v79_v4 }
  0x8f   :  { %v82_v7 = vmax.f32 %v80_v5, 0.0 }
  0x91   :  { %v87_v8 = vmul.f32 %v110_v6, %v82_v7 }
  0x93   :  { %v89_v9 = vsel %vm88_vm1, %v87_v8, 0.0 }
  0x94   :  { %90 = vadd.xlane.f32.xlu0 %v89_v9 }
 0x107   :  { %v91_v11 = vpop.xlane.xlu0 %90 }
 0x108   :  { %v94_v12 = vadd.f32 %v93_v10, %v91_v11 }
 0x10a   :  { %111 = vtanh.f32 %v94_v12 }
 0x110   :  { %v112_v13 = vpop.eup %111 }
 0x111   :  { %97 = vst.msk [vmem:[%s222_s5] sm:$0xff] %vm96_vm2, %v112_v13 }
 0x112   :  { %102 = vsyncpa [#allocation4], 1 }
 0x113   :  { %103 = vsyncpa [#allocation6], 1 }

</bundles_post_ra>
